<compile_context>
chip_gen: v6e
topology: v6e:2x2x1
jax: 0.10.0
libtpu: 0.0.40
codegen_flags: <defaults>
</compile_context>

<pallas_src>
import math

import jax
import jax.numpy as jnp
from jax import lax
from jax.experimental import pallas as pl
from jax.experimental.pallas import tpu as pltpu


# ------------------------------------------------------------------- kernel factories


def _make_fused_kernel(n_valid, mask_k):
    """Row tile: acc += adj_tile @ x_tile over K tiles; finalize out = acc @ W."""

    def kernel(adj_ref, x_ref, w_ref, out_ref, acc_ref):
        k = pl.program_id(1)

        @pl.when(k == 0)
        def _init():
            acc_ref[...] = jnp.zeros_like(acc_ref)

        a = adj_ref[...]
        if mask_k:  # zero the overhanging columns of the (unpadded) adjacency's last K tile
            col = lax.broadcasted_iota(jnp.int32, a.shape, 1)
            a = jnp.where(col < (n_valid - k * a.shape[1]), a, 0.0)
        acc_ref[...] += jnp.dot(a.astype(jnp.bfloat16), x_ref[...],
                                preferred_element_type=jnp.float32)

        @pl.when(k == pl.num_programs(1) - 1)
        def _finalize():
            out_ref[...] = jnp.dot(acc_ref[...].astype(jnp.bfloat16), w_ref[...],
                                   preferred_element_type=jnp.float32
                                   ).astype(out_ref.dtype)

    return kernel


def _make_propagate_kernel(n_valid, mask_k):
    """Row tile: acc += adj_tile @ support_tile over K tiles (support = x @ W)."""

    def kernel(adj_ref, s_ref, out_ref, acc_ref):
        k = pl.program_id(1)

        @pl.when(k == 0)
        def _init():
            acc_ref[...] = jnp.zeros_like(acc_ref)

        a = adj_ref[...]
        if mask_k:
            col = lax.broadcasted_iota(jnp.int32, a.shape, 1)
            a = jnp.where(col < (n_valid - k * a.shape[1]), a, 0.0)
        acc_ref[...] += jnp.dot(a.astype(jnp.bfloat16), s_ref[...],
                                preferred_element_type=jnp.float32)

        @pl.when(k == pl.num_programs(1) - 1)
        def _finalize():
            out_ref[...] = acc_ref[...].astype(out_ref.dtype)

    return kernel


# --------------------------------------------------------------------------- planning


def _round_up(a, b):
    return ((a + b - 1) // b) * b


def _vmem_capacity_bytes():
    try:
        return int(pltpu.get_tpu_info().vmem_capacity_bytes)
    except Exception:
        return 64 * 1024 * 1024  # conservative: v7x per-TensorCore VMEM


def _plan_tiles(n, adj_itemsize, rhs_width, out_dim, w_rows, vmem_bytes):
    """Pick (TM, TK). Honest per-step VMEM accounting: adj double buffers (caller dtype)
    + in-kernel bf16 cast temp + double-buffered rhs (bf16) + W slab (bf16, fused path)
    + f32 output double buffers + f32 accumulator scratch."""
    budget = int(vmem_bytes * 0.6)      # headroom for Mosaic internal scratch/temporaries

    def row_tile_for(tk):
        fixed = 2 * tk * rhs_width * 2 + 2 * w_rows * out_dim * 2
        per_row = (2 * tk * adj_itemsize   # adj double buffer
                   + tk * 2                # bf16 cast of the adj tile
                   + 2 * out_dim * 4       # f32 output double buffer
                   + rhs_width * 4)        # f32 accumulator scratch
        avail = budget - fixed
        tm = avail // per_row if avail > 0 else 0
        tm = (tm // 128) * 128 if tm >= 128 else (tm // 8) * 8
        tm = min(tm, _round_up(n, 8))      # never exceed the (8-aligned) row count
        if n >= 512:                       # >= 4 row tiles keeps both v7x TCs busy
            tm = min(tm, max(128, _round_up(-(-n // 4), 128)))
        return max(tm, 0)

    # Prefer a single full-width K block (== adj's real width: no padding, no masking).
    tm = row_tile_for(n)
    if tm >= min(256, _round_up(n, 8)):
        return tm, n
    # Large graph: 128-aligned K tiles keep VMEM N-independent and TM at a useful size.
    tk = 512
    return max(row_tile_for(tk), 8), tk


# ---------------------------------------------------------------------------- wrapper


def gcn1_forward(x, adj, weight, bias=None):
    """GCN1.forward: adj @ (x @ weight). `bias` accepted but unused (matches PyTorch)."""
    del bias  # GraphConvolution1.forward never adds the bias
    n, in_dim = x.shape
    out_dim = weight.shape[1]
    assert adj.shape == (n, n)

    vmem = _vmem_capacity_bytes()
    in_pad = _round_up(in_dim, 128)
    # Contract adj against the narrower operand: raw features (project by W at finalize)
    # when the padded feature width does not exceed the output width; otherwise
    # precompute support = x @ W and only stream adj in the kernel.
    fused = in_pad <= _round_up(out_dim, 128)
    rhs_width = in_pad if fused else out_dim
    w_rows = in_pad if fused else 0

    tm, tk = _plan_tiles(n, adj.dtype.itemsize, rhs_width, out_dim, w_rows, vmem)
    k_grid = pl.cdiv(n, tk)
    k_rows = k_grid * tk                 # rhs rows are zero-padded up to this (cheap)
    mask_k = (k_rows != n)               # adj's last K tile overhangs -> mask in-kernel
    grid = (pl.cdiv(n, tm), k_grid)

    cdt = jnp.bfloat16
    adj_spec = pl.BlockSpec((tm, tk), lambda i, k: (i, k))
    out_spec = pl.BlockSpec((tm, out_dim), lambda i, k: (i, 0))
    out_shape = jax.ShapeDtypeStruct((n, out_dim), jnp.float32)
    compiler_params = pltpu.CompilerParams(
        dimension_semantics=("parallel", "arbitrary"),
        vmem_limit_bytes=int(vmem * 0.85),
    )

    # TODO(synk): pipeline_mode=pl.Buffered(1) on the grid-invariant x/W/support specs
    # would halve their VMEM footprint; left at the default for lowering portability.
    # TODO(synk): fp8 (v7x) / int8 (v6e) adj tiles with per-row scales would halve the
    # dominant HBM stream again; needs an accuracy check for the target graphs.
    if fused:
        x_p = jnp.pad(x.astype(cdt), ((0, k_rows - n), (0, in_pad - in_dim)))
        w_p = jnp.pad(weight.astype(cdt), ((0, in_pad - in_dim), (0, 0)))
        y = pl.pallas_call(
            _make_fused_kernel(n, mask_k),
            out_shape=out_shape,
            grid=grid,
            in_specs=[
                adj_spec,
                pl.BlockSpec((tk, in_pad), lambda i, k: (k, 0)),
                pl.BlockSpec((in_pad, out_dim), lambda i, k: (0, 0)),
            ],
            out_specs=out_spec,
            scratch_shapes=[pltpu.VMEM((tm, in_pad), jnp.float32)],
            compiler_params=compiler_params,
        )(adj, x_p, w_p)
    else:
        # Wide input features: support = x @ W is O(N*in*out), tiny next to the O(N^2)
        # propagation, so compute it once outside and stream only adj inside the kernel.
        support = jnp.dot(x.astype(cdt), weight.astype(cdt),
                          preferred_element_type=jnp.float32).astype(cdt)
        support = jnp.pad(support, ((0, k_rows - n), (0, 0)))
        y = pl.pallas_call(
            _make_propagate_kernel(n, mask_k),
            out_shape=out_shape,
            grid=grid,
            in_specs=[
                adj_spec,
                pl.BlockSpec((tk, out_dim), lambda i, k: (k, 0)),
            ],
            out_specs=out_spec,
            scratch_shapes=[pltpu.VMEM((tm, out_dim), jnp.float32)],
            compiler_params=compiler_params,
        )(adj, support)

    return y  # already exactly (n, out_dim) f32 — no post-kernel slice needed


# ---------------------------------------------------------------------------- helpers


def init_gc_params(key, in_features, out_features):
    """Mimic GraphConvolution1.reset_parameters (uniform(-stdv, stdv), stdv=1/sqrt(out))."""
    stdv = 1.0 / math.sqrt(out_features)
    kw, kb = jax.random.split(key)
    w = jax.random.uniform(kw, (in_features, out_features), jnp.float32,
                           minval=-stdv, maxval=stdv)
    b = jax.random.uniform(kb, (out_features,), jnp.float32,
                           minval=-stdv, maxval=stdv)  # unused in forward()
    return w, b


def reference_forward(x, adj, w):
    return adj @ (x @ w)


def make_graph(key, n, in_dim):
    kx, kadj = jax.random.split(key)
    x = jax.random.normal(kx, (n, in_dim), jnp.float32)
    a = jax.random.uniform(kadj, (n, n), jnp.float32)
    a = (a + a.T) * 0.5 + jnp.eye(n, dtype=jnp.float32)        # symmetric + self-loops
    adj = a / jnp.sum(a, axis=1, keepdims=True)                # row-normalized
    return x, adj


# ------------------------------------------------------------------------------- demo


if __name__ == "__main__":
    key = jax.random.PRNGKey(0)
    k_g1, k_w1, k_g2, k_w2 = jax.random.split(key, 4)

    # Case 1: small graph, narrow features — exercises the fused (adj @ x) @ W path.
    N, IN_DIM, OUT_DIM = 64, 8, 8
    x, adj = make_graph(k_g1, N, IN_DIM)
    w1, b1 = init_gc_params(k_w1, IN_DIM, OUT_DIM)
    y = gcn1_forward(x, adj, w1, b1)
    jax.block_until_ready(y)
    y_ref = reference_forward(x, adj, w1)
    assert y.shape == (N, OUT_DIM)
    assert jnp.allclose(y, y_ref, atol=3e-2, rtol=3e-2), "fused path mismatch"

    # Case 2: wide input features — exercises the precomputed-support propagation path.
    N2, IN2, OUT2 = 40, 160, 8
    x2, adj2 = make_graph(k_g2, N2, IN2)
    w2, b2 = init_gc_params(k_w2, IN2, OUT2)
    y2 = gcn1_forward(x2, adj2, w2, b2)
    jax.block_until_ready(y2)
    y2_ref = reference_forward(x2, adj2, w2)
    assert y2.shape == (N2, OUT2)
    assert jnp.allclose(y2, y2_ref, atol=3e-2, rtol=3e-2), "support path mismatch"

    print("KERNEL_OK")
</pallas_src>

<mosaic_0001>
module attributes {stable_mosaic.version = 11 : i64} {
  func.func @kernel(%arg0: i32, %arg1: i32, %arg2: memref<64x64xf32, #tpu.memory_space<vmem>>, %arg3: memref<64x128xbf16, #tpu.memory_space<vmem>>, %arg4: memref<128x8xbf16, #tpu.memory_space<vmem>>, %arg5: memref<64x8xf32, #tpu.memory_space<vmem>>, %arg6: memref<64x128xf32, #tpu.memory_space<vmem>>) attributes {dimension_semantics = [#tpu.dimension_semantics<parallel>, #tpu.dimension_semantics<arbitrary>], iteration_bounds = array<i64: 1, 1>, scalar_prefetch = 0 : i64, scratch_operands = 1 : i64, tpu.core_type = #tpu.core_type<tc>, window_params = [{transform_indices = @transform_0, window_bounds = array<i64: 64, 64>}, {transform_indices = @transform_1, window_bounds = array<i64: 64, 128>}, {pipeline_mode = #tpu.pipeline_mode<synchronous>, transform_indices = @transform_2, window_bounds = array<i64: 128, 8>}, {transform_indices = @transform_3, window_bounds = array<i64: 64, 8>}]} {
    %c0_i32 = arith.constant 0 : i32
    %0 = arith.cmpi eq, %arg1, %c0_i32 : i32
    %1 = arith.extui %0 : i1 to i32
    %c0_i32_0 = arith.constant 0 : i32
    %2 = arith.cmpi ne, %1, %c0_i32_0 : i32
    scf.if %2 {
      %cst_10 = arith.constant 0.000000e+00 : f32
      %13 = vector.broadcast %cst_10 : f32 to vector<64x128xf32>
      %c0_11 = arith.constant 0 : index
      %c0_12 = arith.constant 0 : index
      %14 = vector.load %arg6[%c0_11, %c0_12] : memref<64x128xf32, #tpu.memory_space<vmem>>, vector<64x128xf32>
      tpu.vector_store %arg6[%c0_11, %c0_12], %13 {strides = array<i32>} : memref<64x128xf32, #tpu.memory_space<vmem>>, vector<64x128xf32>,
    } else {
    }
    %c0 = arith.constant 0 : index
    %c0_1 = arith.constant 0 : index
    %3 = vector.load %arg2[%c0, %c0_1] : memref<64x64xf32, #tpu.memory_space<vmem>>, vector<64x64xf32>
    %c0_2 = arith.constant 0 : index
    %c0_3 = arith.constant 0 : index
    %4 = vector.load %arg6[%c0_2, %c0_3] : memref<64x128xf32, #tpu.memory_space<vmem>>, vector<64x128xf32>
    %5 = arith.truncf %3 : vector<64x64xf32> to vector<64x64xbf16>
    %c0_4 = arith.constant 0 : index
    %c0_5 = arith.constant 0 : index
    %6 = vector.load %arg3[%c0_4, %c0_5] : memref<64x128xbf16, #tpu.memory_space<vmem>>, vector<64x128xbf16>
    %cst = arith.constant dense<0.000000e+00> : vector<64x128xf32>
    %7 = tpu.matmul %5, %6, %cst {dimension_numbers = #tpu.dot_dimension_numbers<[1], [0], [0], [1], [0, 0, 1, 1], [], []>} : vector<64x64xbf16>, vector<64x128xbf16>, vector<64x128xf32> -> vector<64x128xf32>
    %8 = arith.addf %4, %7 : vector<64x128xf32>
    %c0_6 = arith.constant 0 : index
    %c0_7 = arith.constant 0 : index
    %9 = vector.load %arg6[%c0_6, %c0_7] : memref<64x128xf32, #tpu.memory_space<vmem>>, vector<64x128xf32>
    tpu.vector_store %arg6[%c0_6, %c0_7], %8 {strides = array<i32>} : memref<64x128xf32, #tpu.memory_space<vmem>>, vector<64x128xf32>,
    %c0_i32_8 = arith.constant 0 : i32
    %10 = arith.cmpi eq, %arg1, %c0_i32_8 : i32
    %11 = arith.extui %10 : i1 to i32
    %c0_i32_9 = arith.constant 0 : i32
    %12 = arith.cmpi ne, %11, %c0_i32_9 : i32
    scf.if %12 {
      %c0_10 = arith.constant 0 : index
      %c0_11 = arith.constant 0 : index
      %13 = vector.load %arg6[%c0_10, %c0_11] : memref<64x128xf32, #tpu.memory_space<vmem>>, vector<64x128xf32>
      %14 = arith.truncf %13 : vector<64x128xf32> to vector<64x128xbf16>
      %c0_12 = arith.constant 0 : index
      %c0_13 = arith.constant 0 : index
      %15 = vector.load %arg4[%c0_12, %c0_13] : memref<128x8xbf16, #tpu.memory_space<vmem>>, vector<128x8xbf16>
      %cst_14 = arith.constant dense<0.000000e+00> : vector<64x8xf32>
      %16 = tpu.matmul %14, %15, %cst_14 {dimension_numbers = #tpu.dot_dimension_numbers<[1], [0], [0], [1], [0, 0, 1, 1], [], []>} : vector<64x128xbf16>, vector<128x8xbf16>, vector<64x8xf32> -> vector<64x8xf32>
      %c0_15 = arith.constant 0 : index
      %c0_16 = arith.constant 0 : index
      %17 = vector.load %arg5[%c0_15, %c0_16] : memref<64x8xf32, #tpu.memory_space<vmem>>, vector<64x8xf32>
      tpu.vector_store %arg5[%c0_15, %c0_16], %16 {strides = array<i32>} : memref<64x8xf32, #tpu.memory_space<vmem>>, vector<64x8xf32>,
    } else {
    }
    return
  }
  func.func @transform_0(%arg0: i32, %arg1: i32) -> (i32, i32) {
    %c0_i32 = arith.constant 0 : i32
    return %arg0, %arg1 : i32, i32
  }
  func.func @transform_1(%arg0: i32, %arg1: i32) -> (i32, i32) {
    %c0_i32 = arith.constant 0 : i32
    %c0_i32_0 = arith.constant 0 : i32
    return %arg1, %c0_i32 : i32, i32
  }
  func.func @transform_2(%arg0: i32, %arg1: i32) -> (i32, i32) {
    %c0_i32 = arith.constant 0 : i32
    %c0_i32_0 = arith.constant 0 : i32
    %c0_i32_1 = arith.constant 0 : i32
    return %c0_i32, %c0_i32_0 : i32, i32
  }
  func.func @transform_3(%arg0: i32, %arg1: i32) -> (i32, i32) {
    %c0_i32 = arith.constant 0 : i32
    %c0_i32_0 = arith.constant 0 : i32
    return %arg0, %c0_i32 : i32, i32
  }
}

</mosaic_0001>

<bundles_post_ra>
// kernel: tpu_custom_call.1
= control target key start
LH: loop header
LB: loop body
LE: loop exit
PB: predicated region body
PF: predicated region fallthrough
CT: control target
= control target key end

     0   :  { %8 = vsyncpa [#allocation4], 0  ;;  %s458_s12 = smov [#allocation3]   ;;  %s568_s0 = inlined_call_operand.vmem [shape: f32[64,64], index: 0, kind: input, shape index: {}]   ;;  %s569_s1 = inlined_call_operand.hbm [shape: bf16[64,128], index: 1, kind: input, shape index: {}]   ;;  %s570_s2 = inlined_call_operand.vmem [shape: bf16[128,8], index: 2, kind: input, shape index: {}]   ;;  %s571_s3 = inlined_call_operand.vmem [shape: f32[64,8], index: 3, kind: output, shape index: {}]  }
   0x1   :  { %s16_s13 = sshll.u32 %s458_s12, 4  ;;  %s17_s13 = int_to_ptr.vmem [resolvable:$true] %s16_s13 }
   0x2   :  { %s444_s14 = scalar_lea.vmem %s17_s13, 512  ;;  %p449_p1 = scmp.lt.s32.totalorder %s17_s13, %s17_s13 }
   0x3   :  { %p445_p0 = scmp.ne.s32.totalorder %s17_s13, %s444_s14  ;;  %p450_p2 = scmp.lt.s32.totalorder %s444_s14, %s444_s14 }
   0x5   :  { %p451_p3 = por %p450_p2, %p449_p1 }
   0x7   :  { %p452_p4 = pnand %p451_p3, %p445_p0 }
   0x9   :  { %455 = shalt.err (!%p452_p4)
}
   0xa   :  { %s459_s15 = smov 64   ;;  %s460_s16 = smov 4  }
   0xb   :  { %22 = dma.hbm_to_vmem [thread:$0]  %s569_s1, 512, %s17_s13, [#allocation4], %s459_s15, %s459_s15, %s460_s16  }
   0xc   :  { %456 = dma.done.wait [#allocation4], 512  }
   0xd   :  { %457 = vsyncadd [#allocation4], 4294966784  ;;  %v424_v0 = vld [vmem:[#allocation3 + $0x18] sm:$0xff]   ;;  %v425_v1 = vld [vmem:[#allocation3 + $0x10] sm:$0xff]   ;;  %vm93_vm0 = vcmask 523264   ;;  %vm331_vm1 = vcmask 64512  }
   0xe   :  { %381 = vmatprep.subr.bf16.mxu0 %v424_v0  ;;  %v426_v2 = vld [vmem:[#allocation3 + $0x8] sm:$0xff]   ;;  %v41_v3 = vld [vmem:[%s568_s0] sm:$0xff]  ;;  %v428_v7 = vld [vmem:[%s570_s2 + $0x38] sm:$0xff]  }
   0xf   :  { %382 = vmatpush3.bf16.msra.mxu0 %v424_v0  ;;  %v42_v4 = vld [vmem:[%s568_s0 + $0x8] sm:$0xff]  ;;  %v427_v6 = vld [vmem:[#allocation3] sm:$0xff]   ;;  %v429_v8 = vld [vmem:[%s570_s2 + $0x30] sm:$0xff]   ;;  %397 = vmatprep.subr.bf16.mxu1 %v428_v7 }
  0x10   :  { %383 = vmatprep.subr.bf16.mxu0 %v425_v1  ;;  %v57_v5 = vpack.c.bf16 %v42_v4, %v41_v3  ;;  %v43_v9 = vld [vmem:[%s568_s0 + $0x10] sm:$0xff]  ;;  %v44_v10 = vld [vmem:[%s568_s0 + $0x18] sm:$0xff]  ;;  %v45_v11 = vld [vmem:[%s568_s0 + $0x20] sm:$0xff]  ;;  %398 = vmatpush3.bf16.msra.mxu1 %v428_v7 }
  0x11   :  { %399 = vmatprep.subr.bf16.mxu1 %v429_v8  ;;  %v430_v12 = vld [vmem:[%s570_s2 + $0x28] sm:$0xff]   ;;  %v58_v14 = vpack.c.bf16 %v44_v10, %v43_v9  ;;  %v431_v16 = vld [vmem:[%s570_s2 + $0x20] sm:$0xff]   ;;  %v47_v17 = vld [vmem:[%s568_s0 + $0x30] sm:$0xff] }
  0x12   :  { %389 = vmatprep.mubr.msk.bf16.mxu0 %vm93_vm0, %v57_v5  ;;  %v46_v13 = vld [vmem:[%s568_s0 + $0x28] sm:$0xff]  ;;  %v48_v18 = vld [vmem:[%s568_s0 + $0x38] sm:$0xff]  ;;  %v433_v21 = vld [vmem:[%s570_s2 + $0x10] sm:$0xff]  }
  0x13   :  { %384 = vmatpush3.bf16.msra.mxu0 %v425_v1  ;;  %v59_v15 = vpack.c.bf16 %v46_v13, %v45_v11  ;;  %v432_v19 = vld [vmem:[%s570_s2 + $0x18] sm:$0xff]   ;;  %v60_v20 = vpack.c.bf16 %v48_v18, %v47_v17  ;;  %v434_v22 = vld [vmem:[%s570_s2 + $0x8] sm:$0xff]   ;;  %v435_v23 = vld [vmem:[%s570_s2] sm:$0xff]  }
  0x14   :  { %385 = vmatprep.subr.bf16.mxu0 %v426_v2  ;;  %400 = vmatpush3.bf16.msra.mxu1 %v429_v8 }
  0x15   :  { %401 = vmatprep.subr.bf16.mxu1 %v430_v12 }
  0x17   :  { %386 = vmatpush3.bf16.msra.mxu0 %v426_v2 }
  0x18   :  { %387 = vmatprep.subr.bf16.mxu0 %v427_v6  ;;  %402 = vmatpush3.bf16.msra.mxu1 %v430_v12 }
  0x19   :  { %403 = vmatprep.subr.bf16.mxu1 %v431_v16 }
  0x1b   :  { %388 = vmatpush3.bf16.msra.mxu0 %v427_v6 }
  0x1c   :  { %404 = vmatpush3.bf16.msra.mxu1 %v431_v16 }
  0x1d   :  { %405 = vmatprep.subr.bf16.mxu1 %v432_v19 }
  0x1e   :  { %390 = vmatmul.mubr.msk.bf16.vlgmr.msra.gmra.mxu0 %vm93_vm0, %v58_v14 }
  0x1f   :  { %393 = vmatprep.mubr.msk.bf16.mxu0 %vm93_vm0, %v59_v15 }
  0x20   :  { %406 = vmatpush3.bf16.msra.mxu1 %v432_v19 }
  0x21   :  { %407 = vmatprep.subr.bf16.mxu1 %v433_v21 }
  0x24   :  { %408 = vmatpush3.bf16.msra.mxu1 %v433_v21 }
  0x25   :  { %409 = vmatprep.subr.bf16.mxu1 %v434_v22 }
  0x26   :  { %394 = vmatmul.mubr.msk.bf16.gmra.mxu0 %vm93_vm0, %v60_v20 }
  0x28   :  { %410 = vmatpush3.bf16.msra.mxu1 %v434_v22 }
  0x29   :  { %411 = vmatprep.subr.bf16.mxu1 %v435_v23 }
  0x2c   :  { %412 = vmatpush3.bf16.msra.mxu1 %v435_v23 }
  0xde   :  { %v391_v24 = vpop.f32.mrf.mxu0 }
  0xe0   :  { %v140_v25 = vpop.f32.mrf.mxu0 }
  0xe2   :  { %v392_v26 = vpop.f32.mrf.mxu0 }
  0xe3   :  { %v199_v29 = vpack.c.bf16 %v392_v26, %v391_v24 }
  0xe4   :  { %v143_v27 = vpop.f32.mrf.mxu0 }
  0xe5   :  { %v198_v28 = vpack.c.bf16 %v143_v27, %v140_v25 }
  0xe6   :  { %v395_v30 = vpop.f32.mrf.mxu0 }
  0xe7   :  { %413 = vmatprep.mubr.bf16.mxu1 %v198_v28 }
  0xe8   :  { %v156_v31 = vpop.f32.mrf.mxu0  ;;  %414 = vmatmul.mubr.bf16.vlgmr.msra.gmra.mxu1 %v199_v29 }
  0xea   :  { %v396_v32 = vpop.f32.mrf.mxu0 }
  0xeb   :  { %v201_v35 = vpack.c.bf16 %v396_v32, %v395_v30 }
  0xec   :  { %v159_v33 = vpop.f32.mrf.mxu0 }
  0xed   :  { %v200_v34 = vpack.c.bf16 %v159_v33, %v156_v31 }
  0xef   :  { %417 = vmatprep.mubr.bf16.mxu1 %v200_v34 }
  0xf0   :  { %418 = vmatmul.mubr.bf16.gmra.mxu1 %v201_v35 }
 0x1a8   :  { %v415_v36 = vpop.f32.mrf.mxu1 }
 0x1a9   :  { %334 = vst.msk [vmem:[%s571_s3 + $0x10] sm:$0xff] %vm331_vm1, %v415_v36 }
 0x1aa   :  { %v300_v37 = vpop.f32.mrf.mxu1 }
 0x1ab   :  { %332 = vst.msk [vmem:[%s571_s3] sm:$0xff] %vm331_vm1, %v300_v37 }
 0x1ac   :  { %v416_v38 = vpop.f32.mrf.mxu1 }
 0x1ad   :  { %335 = vst.msk [vmem:[%s571_s3 + $0x18] sm:$0xff] %vm331_vm1, %v416_v38 }
 0x1ae   :  { %v303_v39 = vpop.f32.mrf.mxu1 }
 0x1af   :  { %333 = vst.msk [vmem:[%s571_s3 + $0x8] sm:$0xff] %vm331_vm1, %v303_v39 }
 0x1b0   :  { %v419_v40 = vpop.f32.mrf.mxu1 }
 0x1b1   :  { %338 = vst.msk [vmem:[%s571_s3 + $0x30] sm:$0xff] %vm331_vm1, %v419_v40 }
 0x1b2   :  { %v316_v41 = vpop.f32.mrf.mxu1 }
 0x1b3   :  { %336 = vst.msk [vmem:[%s571_s3 + $0x20] sm:$0xff] %vm331_vm1, %v316_v41 }
 0x1b4   :  { %v420_v42 = vpop.f32.mrf.mxu1 }
 0x1b5   :  { %339 = vst.msk [vmem:[%s571_s3 + $0x38] sm:$0xff] %vm331_vm1, %v420_v42 }
 0x1b6   :  { %v319_v43 = vpop.f32.mrf.mxu1 }
 0x1b7   :  { %337 = vst.msk [vmem:[%s571_s3 + $0x28] sm:$0xff] %vm331_vm1, %v319_v43 }
 0x1b8   :  { %344 = vsyncpa [#allocation4], 1 }

</bundles_post_ra>
